<compile_context>
chip_gen: v5e
topology: v5e:2x2
jax: 0.10.0
libtpu: 0.0.40
codegen_flags: <defaults>
</compile_context>

<pallas_src>
import jax
import jax.numpy as jnp
from jax import lax
from jax.experimental import pallas as pl
from jax.experimental.pallas import tpu as pltpu

BN_EPS = 1e-5
MATMUL_DTYPE = jnp.bfloat16                 # MXU operand dtype (accumulation stays f32)
ROW_BLOCK_TARGET_BYTES = 4 * 1024 * 1024    # target f32 output tile per grid step
MAX_FOLDED_OP_BYTES = 8 * 1024 * 1024       # VMEM budget for the folded interp*conv operator
VMEM_LIMIT_BYTES = 48 * 1024 * 1024


# ---------------------------------------------------------------------------
# Shared tile body: bilinear 2x upsample + 3x3 conv for one (batch, row-block).
# ---------------------------------------------------------------------------
def _upconv_rows(x_ref, ah_ref, g_ref):
    """x_ref: (H, W*C_in) bf16, ah_ref: (tr+2, H) bf16, g_ref: (3, W*C_in, W2*C_out) bf16.
    Returns conv output rows (tr, W2*C_out) f32 (lane index = co*W2 + ow)."""
    tr = ah_ref.shape[0] - 2
    # H-interpolation; the conv's vertical zero-padding is encoded as zero rows of ah.
    z = jnp.dot(ah_ref[...], x_ref[...], preferred_element_type=jnp.float32)
    z = z.astype(g_ref.dtype)
    # W-interpolation + horizontal zero-padding + all 9 conv taps, folded into g_ref.
    y = jnp.dot(z[0:tr], g_ref[0], preferred_element_type=jnp.float32)
    y = y + jnp.dot(z[1:tr + 1], g_ref[1], preferred_element_type=jnp.float32)
    y = y + jnp.dot(z[2:tr + 2], g_ref[2], preferred_element_type=jnp.float32)
    return y


def _stats_kernel(x_ref, ah_ref, g_ref, stats_ref):
    """Pass A: per-tile, per-lane shifted first/second moments for exact global BN."""
    y = _upconv_rows(x_ref, ah_ref, g_ref)            # (tr, Lout) f32
    rows = y.shape[0]
    s1 = jnp.sum(y, axis=0, keepdims=True)            # (1, Lout)
    d = y - s1 * (1.0 / rows)                         # shift by the tile mean (no E[y^2]-E[y]^2)
    stats_ref[0:1, :] = s1
    stats_ref[1:2, :] = jnp.sum(d * d, axis=0, keepdims=True)


def _norm_relu_kernel(x_ref, ah_ref, g_ref, scale_ref, shift_ref, o_ref):
    """Pass B: recompute the tile, apply folded BN scale/shift + ReLU, lane-dense store."""
    y = _upconv_rows(x_ref, ah_ref, g_ref)
    o_ref[...] = jnp.maximum(y * scale_ref[...] + shift_ref[...], 0.0)


# ---------------------------------------------------------------------------
# Glue helpers (all O(|x|) layout or O(W^2 * C_in * C_out) operator folding).
# ---------------------------------------------------------------------------
def _bilinear_matrix(n_in: int):
    """Interp matrix matching nn.Upsample(scale_factor=2, mode='bilinear',
    align_corners=False): out_rows = M @ in_rows.  Weights are exact in bf16."""
    n_out = 2 * n_in
    rows = []
    for o in range(n_out):
        src = (o + 0.5) / 2.0 - 0.5
        src = max(src, 0.0)                    # PyTorch clamps negative src to 0
        i0 = min(int(src), n_in - 1)
        i1 = min(i0 + 1, n_in - 1)
        frac = src - i0
        row = [0.0] * n_in
        row[i0] += 1.0 - frac
        row[i1] += frac
        rows.append(row)
    return jnp.asarray(rows, dtype=jnp.float32)       # (2*n_in, n_in)


def _pick_row_block(h2: int, lanes_out: int, n_batch: int) -> int:
    """Output rows per grid step: a multiple of 8 dividing h2 (or h2 itself, which is
    always legal as a full-extent block), keeping the f32 output tile near
    ROW_BLOCK_TARGET_BYTES and leaving >= 2 total grid steps for megacore."""
    if h2 % 8 != 0:
        return h2
    divs = [d for d in range(8, h2 + 1, 8) if h2 % d == 0]
    fit = [d for d in divs if d * lanes_out * 4 <= ROW_BLOCK_TARGET_BYTES] or divs[:1]
    tr = max(fit)
    if n_batch * (h2 // tr) < 2:
        split = [d for d in fit if h2 // d >= 2]
        if split:
            tr = max(split)
    return tr


def up_conv_forward(x, conv_w, conv_b, gamma, beta):
    """x: (N, C_in, H, W) f32 NCHW -> (N, C_out, 2H, 2W) f32 NCHW."""
    del conv_b  # exactly cancelled by the training-mode BatchNorm mean subtraction
    N, C_in, H, W = x.shape
    C_out = conv_w.shape[0]
    H2, W2 = 2 * H, 2 * W
    lin = W * C_in                    # fused input lane width  (w-major, c-minor)
    lout = C_out * W2                 # fused output lane width (co-major, ow-minor)

    tr = _pick_row_block(H2, lout, N)     # output rows per grid step
    nb = H2 // tr

    # NCHW -> (N, H, W*C_in): one pass over the small (pre-upsample) input, bf16.
    x_in = x.astype(MATMUL_DTYPE).transpose(0, 2, 3, 1).reshape(N, H, lin)

    # Per-row-block H-interp matrices with the conv's vertical zero padding folded in.
    a_h = _bilinear_matrix(H)                                            # (H2, H)
    ah_pad = jnp.zeros((H2 + 2, H), jnp.float32).at[1:H2 + 1].set(a_h)
    ah_blocks = jnp.stack(
        [ah_pad[b * tr:b * tr + tr + 2] for b in range(nb)]).astype(MATMUL_DTYPE)

    # Folded operator: g[ky, w*C_in+c, co*W2+ow] = sum_kx Aw_pad[ow+kx, w] * Wt[co, c, ky, kx].
    a_w = _bilinear_matrix(W)                                            # (W2, W)
    aw_pad = jnp.zeros((W2 + 2, W), jnp.float32).at[1:W2 + 1].set(a_w)
    aw_k = jnp.stack([aw_pad[kx:kx + W2] for kx in range(3)])            # (3, W2, W)
    g_taps = jnp.einsum("xpw,oiyx->ywiop", aw_k, conv_w.astype(jnp.float32))
    g_taps = g_taps.reshape(3, lin, lout).astype(MATMUL_DTYPE)

    g_bytes = 3 * lin * lout * jnp.dtype(MATMUL_DTYPE).itemsize
    assert g_bytes <= MAX_FOLDED_OP_BYTES, (
        f"folded interp*conv operator needs {g_bytes} bytes of VMEM; use the two-stage "
        "path (see TODO at top of file) for this shape")

    common_in_specs = [
        pl.BlockSpec((None, H, lin), lambda n, b: (n, 0, 0)),        # full low-res image
        pl.BlockSpec((None, tr + 2, H), lambda n, b: (b, 0, 0)),     # per-block H-interp
        pl.BlockSpec((3, lin, lout), lambda n, b: (0, 0, 0)),        # folded op (VMEM-resident)
    ]
    cparams = pltpu.CompilerParams(
        dimension_semantics=("parallel", "parallel"),
        vmem_limit_bytes=VMEM_LIMIT_BYTES)

    # -------- pass A: per-tile BN partial statistics (no conv output written to HBM) ----
    stats = pl.pallas_call(
        _stats_kernel,
        out_shape=jax.ShapeDtypeStruct((N, nb, 2, lout), jnp.float32),
        grid=(N, nb),
        in_specs=common_in_specs,
        out_specs=pl.BlockSpec((None, None, 2, lout), lambda n, b: (n, b, 0, 0)),
        compiler_params=cparams,
    )(x_in, ah_blocks, g_taps)

    # -------- fold exact global batch stats into per-lane scale / shift (tiny, XLA) ------
    t = N * nb
    s1 = stats[:, :, 0, :].reshape(t, lout)
    s2 = stats[:, :, 1, :].reshape(t, lout)
    cnt = jnp.float32(N * H2 * W2)                                  # samples per channel
    mean_c = jnp.sum(s1.reshape(t, C_out, W2), axis=(0, 2)) / cnt
    mean_l = jnp.repeat(mean_c, W2)[None, :]                        # (1, lout)
    # Chan-style combine of the per-tile shifted second moments (cancellation-safe).
    ss = s2 + jnp.float32(tr) * (s1 / jnp.float32(tr) - mean_l) ** 2
    var_c = jnp.sum(ss.reshape(t, C_out, W2), axis=(0, 2)) / cnt    # biased var (PyTorch BN)
    scale_c = gamma.astype(jnp.float32) * lax.rsqrt(var_c + BN_EPS)
    shift_c = beta.astype(jnp.float32) - mean_c * scale_c
    scale_l = jnp.repeat(scale_c, W2).reshape(1, lout)
    shift_l = jnp.repeat(shift_c, W2).reshape(1, lout)

    # -------- pass B: recompute tile, normalize + ReLU, store NHCW lane-dense ------------
    out_nhcw = pl.pallas_call(
        _norm_relu_kernel,
        out_shape=jax.ShapeDtypeStruct((N, H2, lout), jnp.float32),
        grid=(N, nb),
        in_specs=common_in_specs + [
            pl.BlockSpec((1, lout), lambda n, b: (0, 0)),
            pl.BlockSpec((1, lout), lambda n, b: (0, 0)),
        ],
        out_specs=pl.BlockSpec((None, tr, lout), lambda n, b: (n, b, 0)),
        compiler_params=cparams,
    )(x_in, ah_blocks, g_taps, scale_l, shift_l)

    # (N, H2, C_out, W2) -> (N, C_out, H2, W2): minor dim stays contiguous (cheap transpose).
    return out_nhcw.reshape(N, H2, C_out, W2).transpose(0, 2, 1, 3)


# ---------------------------------------------------------------------------
# Pure-JAX reference (same math as the PyTorch module, training-mode BN).
# ---------------------------------------------------------------------------
def _reference(x, conv_w, conv_b, gamma, beta):
    _, _, H, W = x.shape
    a_h = _bilinear_matrix(H)
    a_w = _bilinear_matrix(W)
    x_up = jnp.einsum("oh,nchw->ncow", a_h, x.astype(jnp.float32))
    x_up = jnp.einsum("pw,ncow->ncop", a_w, x_up)
    y = lax.conv_general_dilated(
        x_up, conv_w.astype(jnp.float32), (1, 1), ((1, 1), (1, 1)),
        dimension_numbers=("NCHW", "OIHW", "NCHW"))
    y = y + conv_b[None, :, None, None]
    mean = jnp.mean(y, axis=(0, 2, 3), keepdims=True)
    var = jnp.mean((y - mean) ** 2, axis=(0, 2, 3), keepdims=True)
    y = (y - mean) * lax.rsqrt(var + BN_EPS)
    y = gamma[None, :, None, None] * y + beta[None, :, None, None]
    return jnp.maximum(y, 0.0)


if __name__ == "__main__":
    N, C_in, C_out, H, W = 2, 4, 8, 16, 16

    key = jax.random.PRNGKey(0)
    k_x, k_w, k_b, k_g, k_bt = jax.random.split(key, 5)

    x = jax.random.normal(k_x, (N, C_in, H, W), jnp.float32)
    conv_w = 0.1 * jax.random.normal(k_w, (C_out, C_in, 3, 3), jnp.float32)
    conv_b = 0.1 * jax.random.normal(k_b, (C_out,), jnp.float32)
    gamma = 1.0 + 0.05 * jax.random.normal(k_g, (C_out,), jnp.float32)
    beta = 0.05 * jax.random.normal(k_bt, (C_out,), jnp.float32)

    fwd = jax.jit(up_conv_forward)
    out = jax.block_until_ready(fwd(x, conv_w, conv_b, gamma, beta))

    assert out.shape == (N, C_out, 2 * H, 2 * W)
    assert bool(jnp.all(jnp.isfinite(out)))
    assert bool(jnp.all(out >= 0.0))          # ReLU output

    ref = _reference(x, conv_w, conv_b, gamma, beta)
    max_err = float(jnp.max(jnp.abs(out - ref)))
    # bf16 matmul operands (per perf review) give ~1e-2 worst-case error on the unit-scale
    # BN output; with MATMUL_DTYPE = float32 the error is < 1e-3.
    tol = 3e-2 if MATMUL_DTYPE == jnp.bfloat16 else 1e-3
    assert max_err < tol, f"max abs err vs reference: {max_err}"

    print("KERNEL_OK")
</pallas_src>

<mosaic_0001>
module attributes {stable_mosaic.version = 11 : i64} {
  func.func @_stats_kernel(%arg0: i32, %arg1: i32, %arg2: memref<1x16x64xbf16, #tpu.memory_space<vmem>>, %arg3: memref<1x34x16xbf16, #tpu.memory_space<vmem>>, %arg4: memref<3x64x256xbf16, #tpu.memory_space<vmem>>, %arg5: memref<1x1x2x256xf32, #tpu.memory_space<vmem>>) attributes {dimension_semantics = [#tpu.dimension_semantics<parallel>, #tpu.dimension_semantics<parallel>], iteration_bounds = array<i64: 2, 1>, scalar_prefetch = 0 : i64, scratch_operands = 0 : i64, tpu.core_type = #tpu.core_type<tc>, window_params = [{transform_indices = @transform_0, window_bounds = array<i64: 1, 16, 64>}, {transform_indices = @transform_1, window_bounds = array<i64: 1, 34, 16>}, {pipeline_mode = #tpu.pipeline_mode<synchronous>, transform_indices = @transform_2, window_bounds = array<i64: 3, 64, 256>}, {transform_indices = @transform_3, window_bounds = array<i64: 1, 1, 2, 256>}]} {
    %c0 = arith.constant 0 : index
    %c0_0 = arith.constant 0 : index
    %c0_1 = arith.constant 0 : index
    %0 = vector.load %arg3[%c0, %c0_0, %c0_1] : memref<1x34x16xbf16, #tpu.memory_space<vmem>>, vector<1x34x16xbf16>
    %1 = vector.shape_cast %0 : vector<1x34x16xbf16> to vector<34x16xbf16>
    %c0_2 = arith.constant 0 : index
    %c0_3 = arith.constant 0 : index
    %c0_4 = arith.constant 0 : index
    %2 = vector.load %arg2[%c0_2, %c0_3, %c0_4] : memref<1x16x64xbf16, #tpu.memory_space<vmem>>, vector<1x16x64xbf16>
    %3 = vector.shape_cast %2 : vector<1x16x64xbf16> to vector<16x64xbf16>
    %cst = arith.constant dense<0.000000e+00> : vector<34x64xf32>
    %4 = tpu.matmul %1, %3, %cst {dimension_numbers = #tpu.dot_dimension_numbers<[1], [0], [0], [1], [0, 0, 1, 1], [], []>} : vector<34x16xbf16>, vector<16x64xbf16>, vector<34x64xf32> -> vector<34x64xf32>
    %5 = arith.truncf %4 : vector<34x64xf32> to vector<34x64xbf16>
    %6 = vector.extract_strided_slice %5 {offsets = [0, 0], sizes = [32, 64], strides = [1, 1]} : vector<34x64xbf16> to vector<32x64xbf16>
    %c0_5 = arith.constant 0 : index
    %c0_6 = arith.constant 0 : index
    %c0_7 = arith.constant 0 : index
    %7 = vector.load %arg4[%c0_5, %c0_6, %c0_7] : memref<3x64x256xbf16, #tpu.memory_space<vmem>>, vector<1x64x256xbf16>
    %8 = vector.shape_cast %7 : vector<1x64x256xbf16> to vector<64x256xbf16>
    %cst_8 = arith.constant dense<0.000000e+00> : vector<32x256xf32>
    %9 = tpu.matmul %6, %8, %cst_8 {dimension_numbers = #tpu.dot_dimension_numbers<[1], [0], [0], [1], [0, 0, 1, 1], [], []>} : vector<32x64xbf16>, vector<64x256xbf16>, vector<32x256xf32> -> vector<32x256xf32>
    %10 = vector.extract_strided_slice %5 {offsets = [1, 0], sizes = [32, 64], strides = [1, 1]} : vector<34x64xbf16> to vector<32x64xbf16>
    %c1 = arith.constant 1 : index
    %c0_9 = arith.constant 0 : index
    %c0_10 = arith.constant 0 : index
    %11 = vector.load %arg4[%c1, %c0_9, %c0_10] : memref<3x64x256xbf16, #tpu.memory_space<vmem>>, vector<1x64x256xbf16>
    %12 = vector.shape_cast %11 : vector<1x64x256xbf16> to vector<64x256xbf16>
    %cst_11 = arith.constant dense<0.000000e+00> : vector<32x256xf32>
    %13 = tpu.matmul %10, %12, %cst_11 {dimension_numbers = #tpu.dot_dimension_numbers<[1], [0], [0], [1], [0, 0, 1, 1], [], []>} : vector<32x64xbf16>, vector<64x256xbf16>, vector<32x256xf32> -> vector<32x256xf32>
    %14 = arith.addf %9, %13 : vector<32x256xf32>
    %15 = vector.extract_strided_slice %5 {offsets = [2, 0], sizes = [32, 64], strides = [1, 1]} : vector<34x64xbf16> to vector<32x64xbf16>
    %c2 = arith.constant 2 : index
    %c0_12 = arith.constant 0 : index
    %c0_13 = arith.constant 0 : index
    %16 = vector.load %arg4[%c2, %c0_12, %c0_13] : memref<3x64x256xbf16, #tpu.memory_space<vmem>>, vector<1x64x256xbf16>
    %17 = vector.shape_cast %16 : vector<1x64x256xbf16> to vector<64x256xbf16>
    %cst_14 = arith.constant dense<0.000000e+00> : vector<32x256xf32>
    %18 = tpu.matmul %15, %17, %cst_14 {dimension_numbers = #tpu.dot_dimension_numbers<[1], [0], [0], [1], [0, 0, 1, 1], [], []>} : vector<32x64xbf16>, vector<64x256xbf16>, vector<32x256xf32> -> vector<32x256xf32>
    %19 = arith.addf %14, %18 : vector<32x256xf32>
    %cst_15 = arith.constant dense<0.000000e+00> : vector<256xf32>
    %20 = vector.multi_reduction <add>, %19, %cst_15 [0] : vector<32x256xf32> to vector<256xf32>
    %21 = vector.shape_cast %20 : vector<256xf32> to vector<1x256xf32>
    %cst_16 = arith.constant 3.125000e-02 : f32
    %22 = vector.broadcast %cst_16 : f32 to vector<1x256xf32>
    %23 = arith.mulf %21, %22 : vector<1x256xf32>
    %24 = vector.broadcast %23 : vector<1x256xf32> to vector<32x256xf32>
    %25 = arith.subf %19, %24 : vector<32x256xf32>
    %c0_17 = arith.constant 0 : index
    %c0_18 = arith.constant 0 : index
    %c0_19 = arith.constant 0 : index
    %c0_20 = arith.constant 0 : index
    %26 = vector.load %arg5[%c0_17, %c0_18, %c0_19, %c0_20] : memref<1x1x2x256xf32, #tpu.memory_space<vmem>>, vector<1x1x1x256xf32>
    %27 = vector.shape_cast %26 : vector<1x1x1x256xf32> to vector<1x256xf32>
    %28 = vector.shape_cast %21 : vector<1x256xf32> to vector<1x1x1x256xf32>
    tpu.vector_store %arg5[%c0_17, %c0_18, %c0_19, %c0_20], %28 {strides = array<i32>} : memref<1x1x2x256xf32, #tpu.memory_space<vmem>>, vector<1x1x1x256xf32>,
    %29 = arith.mulf %25, %25 : vector<32x256xf32>
    %cst_21 = arith.constant dense<0.000000e+00> : vector<256xf32>
    %30 = vector.multi_reduction <add>, %29, %cst_21 [0] : vector<32x256xf32> to vector<256xf32>
    %31 = vector.shape_cast %30 : vector<256xf32> to vector<1x256xf32>
    %c0_22 = arith.constant 0 : index
    %c0_23 = arith.constant 0 : index
    %c1_24 = arith.constant 1 : index
    %c0_25 = arith.constant 0 : index
    %32 = vector.load %arg5[%c0_22, %c0_23, %c1_24, %c0_25] : memref<1x1x2x256xf32, #tpu.memory_space<vmem>>, vector<1x1x1x256xf32>
    %33 = vector.shape_cast %32 : vector<1x1x1x256xf32> to vector<1x256xf32>
    %34 = vector.shape_cast %31 : vector<1x256xf32> to vector<1x1x1x256xf32>
    tpu.vector_store %arg5[%c0_22, %c0_23, %c1_24, %c0_25], %34 {strides = array<i32>} : memref<1x1x2x256xf32, #tpu.memory_space<vmem>>, vector<1x1x1x256xf32>,
    return
  }
  func.func @transform_0(%arg0: i32, %arg1: i32) -> (i32, i32, i32) {
    %c0_i32 = arith.constant 0 : i32
    %c0_i32_0 = arith.constant 0 : i32
    %c0_i32_1 = arith.constant 0 : i32
    return %arg0, %c0_i32, %c0_i32_0 : i32, i32, i32
  }
  func.func @transform_1(%arg0: i32, %arg1: i32) -> (i32, i32, i32) {
    %c0_i32 = arith.constant 0 : i32
    %c0_i32_0 = arith.constant 0 : i32
    %c0_i32_1 = arith.constant 0 : i32
    return %arg1, %c0_i32, %c0_i32_0 : i32, i32, i32
  }
  func.func @transform_2(%arg0: i32, %arg1: i32) -> (i32, i32, i32) {
    %c0_i32 = arith.constant 0 : i32
    %c0_i32_0 = arith.constant 0 : i32
    %c0_i32_1 = arith.constant 0 : i32
    %c0_i32_2 = arith.constant 0 : i32
    return %c0_i32, %c0_i32_0, %c0_i32_1 : i32, i32, i32
  }
  func.func @transform_3(%arg0: i32, %arg1: i32) -> (i32, i32, i32, i32) {
    %c0_i32 = arith.constant 0 : i32
    %c0_i32_0 = arith.constant 0 : i32
    %c0_i32_1 = arith.constant 0 : i32
    return %arg0, %arg1, %c0_i32, %c0_i32_0 : i32, i32, i32, i32
  }
}

module attributes {stable_mosaic.version = 11 : i64} {
  func.func @_norm_relu_kernel(%arg0: i32, %arg1: i32, %arg2: memref<1x16x64xbf16, #tpu.memory_space<vmem>>, %arg3: memref<1x34x16xbf16, #tpu.memory_space<vmem>>, %arg4: memref<3x64x256xbf16, #tpu.memory_space<vmem>>, %arg5: memref<1x256xf32, #tpu.memory_space<vmem>>, %arg6: memref<1x256xf32, #tpu.memory_space<vmem>>, %arg7: memref<1x32x256xf32, #tpu.memory_space<vmem>>) attributes {dimension_semantics = [#tpu.dimension_semantics<parallel>, #tpu.dimension_semantics<parallel>], iteration_bounds = array<i64: 2, 1>, scalar_prefetch = 0 : i64, scratch_operands = 0 : i64, tpu.core_type = #tpu.core_type<tc>, window_params = [{transform_indices = @transform_0, window_bounds = array<i64: 1, 16, 64>}, {transform_indices = @transform_1, window_bounds = array<i64: 1, 34, 16>}, {pipeline_mode = #tpu.pipeline_mode<synchronous>, transform_indices = @transform_2, window_bounds = array<i64: 3, 64, 256>}, {pipeline_mode = #tpu.pipeline_mode<synchronous>, transform_indices = @transform_3, window_bounds = array<i64: 1, 256>}, {pipeline_mode = #tpu.pipeline_mode<synchronous>, transform_indices = @transform_4, window_bounds = array<i64: 1, 256>}, {transform_indices = @transform_5, window_bounds = array<i64: 1, 32, 256>}]} {
    %c0 = arith.constant 0 : index
    %c0_0 = arith.constant 0 : index
    %c0_1 = arith.constant 0 : index
    %0 = vector.load %arg3[%c0, %c0_0, %c0_1] : memref<1x34x16xbf16, #tpu.memory_space<vmem>>, vector<1x34x16xbf16>
    %1 = vector.shape_cast %0 : vector<1x34x16xbf16> to vector<34x16xbf16>
    %c0_2 = arith.constant 0 : index
    %c0_3 = arith.constant 0 : index
    %c0_4 = arith.constant 0 : index
    %2 = vector.load %arg2[%c0_2, %c0_3, %c0_4] : memref<1x16x64xbf16, #tpu.memory_space<vmem>>, vector<1x16x64xbf16>
    %3 = vector.shape_cast %2 : vector<1x16x64xbf16> to vector<16x64xbf16>
    %cst = arith.constant dense<0.000000e+00> : vector<34x64xf32>
    %4 = tpu.matmul %1, %3, %cst {dimension_numbers = #tpu.dot_dimension_numbers<[1], [0], [0], [1], [0, 0, 1, 1], [], []>} : vector<34x16xbf16>, vector<16x64xbf16>, vector<34x64xf32> -> vector<34x64xf32>
    %5 = arith.truncf %4 : vector<34x64xf32> to vector<34x64xbf16>
    %6 = vector.extract_strided_slice %5 {offsets = [0, 0], sizes = [32, 64], strides = [1, 1]} : vector<34x64xbf16> to vector<32x64xbf16>
    %c0_5 = arith.constant 0 : index
    %c0_6 = arith.constant 0 : index
    %c0_7 = arith.constant 0 : index
    %7 = vector.load %arg4[%c0_5, %c0_6, %c0_7] : memref<3x64x256xbf16, #tpu.memory_space<vmem>>, vector<1x64x256xbf16>
    %8 = vector.shape_cast %7 : vector<1x64x256xbf16> to vector<64x256xbf16>
    %cst_8 = arith.constant dense<0.000000e+00> : vector<32x256xf32>
    %9 = tpu.matmul %6, %8, %cst_8 {dimension_numbers = #tpu.dot_dimension_numbers<[1], [0], [0], [1], [0, 0, 1, 1], [], []>} : vector<32x64xbf16>, vector<64x256xbf16>, vector<32x256xf32> -> vector<32x256xf32>
    %10 = vector.extract_strided_slice %5 {offsets = [1, 0], sizes = [32, 64], strides = [1, 1]} : vector<34x64xbf16> to vector<32x64xbf16>
    %c1 = arith.constant 1 : index
    %c0_9 = arith.constant 0 : index
    %c0_10 = arith.constant 0 : index
    %11 = vector.load %arg4[%c1, %c0_9, %c0_10] : memref<3x64x256xbf16, #tpu.memory_space<vmem>>, vector<1x64x256xbf16>
    %12 = vector.shape_cast %11 : vector<1x64x256xbf16> to vector<64x256xbf16>
    %cst_11 = arith.constant dense<0.000000e+00> : vector<32x256xf32>
    %13 = tpu.matmul %10, %12, %cst_11 {dimension_numbers = #tpu.dot_dimension_numbers<[1], [0], [0], [1], [0, 0, 1, 1], [], []>} : vector<32x64xbf16>, vector<64x256xbf16>, vector<32x256xf32> -> vector<32x256xf32>
    %14 = arith.addf %9, %13 : vector<32x256xf32>
    %15 = vector.extract_strided_slice %5 {offsets = [2, 0], sizes = [32, 64], strides = [1, 1]} : vector<34x64xbf16> to vector<32x64xbf16>
    %c2 = arith.constant 2 : index
    %c0_12 = arith.constant 0 : index
    %c0_13 = arith.constant 0 : index
    %16 = vector.load %arg4[%c2, %c0_12, %c0_13] : memref<3x64x256xbf16, #tpu.memory_space<vmem>>, vector<1x64x256xbf16>
    %17 = vector.shape_cast %16 : vector<1x64x256xbf16> to vector<64x256xbf16>
    %cst_14 = arith.constant dense<0.000000e+00> : vector<32x256xf32>
    %18 = tpu.matmul %15, %17, %cst_14 {dimension_numbers = #tpu.dot_dimension_numbers<[1], [0], [0], [1], [0, 0, 1, 1], [], []>} : vector<32x64xbf16>, vector<64x256xbf16>, vector<32x256xf32> -> vector<32x256xf32>
    %19 = arith.addf %14, %18 : vector<32x256xf32>
    %c0_15 = arith.constant 0 : index
    %c0_16 = arith.constant 0 : index
    %20 = vector.load %arg5[%c0_15, %c0_16] : memref<1x256xf32, #tpu.memory_space<vmem>>, vector<1x256xf32>
    %21 = vector.broadcast %20 : vector<1x256xf32> to vector<32x256xf32>
    %22 = arith.mulf %19, %21 : vector<32x256xf32>
    %c0_17 = arith.constant 0 : index
    %c0_18 = arith.constant 0 : index
    %23 = vector.load %arg6[%c0_17, %c0_18] : memref<1x256xf32, #tpu.memory_space<vmem>>, vector<1x256xf32>
    %24 = vector.broadcast %23 : vector<1x256xf32> to vector<32x256xf32>
    %25 = arith.addf %22, %24 : vector<32x256xf32>
    %cst_19 = arith.constant 0.000000e+00 : f32
    %26 = vector.broadcast %cst_19 : f32 to vector<32x256xf32>
    %27 = arith.maximumf %25, %26 : vector<32x256xf32>
    %c0_20 = arith.constant 0 : index
    %c0_21 = arith.constant 0 : index
    %c0_22 = arith.constant 0 : index
    %28 = vector.load %arg7[%c0_20, %c0_21, %c0_22] : memref<1x32x256xf32, #tpu.memory_space<vmem>>, vector<1x32x256xf32>
    %29 = vector.shape_cast %28 : vector<1x32x256xf32> to vector<32x256xf32>
    %30 = vector.shape_cast %27 : vector<32x256xf32> to vector<1x32x256xf32>
    tpu.vector_store %arg7[%c0_20, %c0_21, %c0_22], %30 {strides = array<i32>} : memref<1x32x256xf32, #tpu.memory_space<vmem>>, vector<1x32x256xf32>,
    return
  }
  func.func @transform_0(%arg0: i32, %arg1: i32) -> (i32, i32, i32) {
    %c0_i32 = arith.constant 0 : i32
    %c0_i32_0 = arith.constant 0 : i32
    %c0_i32_1 = arith.constant 0 : i32
    return %arg0, %c0_i32, %c0_i32_0 : i32, i32, i32
  }
  func.func @transform_1(%arg0: i32, %arg1: i32) -> (i32, i32, i32) {
    %c0_i32 = arith.constant 0 : i32
    %c0_i32_0 = arith.constant 0 : i32
    %c0_i32_1 = arith.constant 0 : i32
    return %arg1, %c0_i32, %c0_i32_0 : i32, i32, i32
  }
  func.func @transform_2(%arg0: i32, %arg1: i32) -> (i32, i32, i32) {
    %c0_i32 = arith.constant 0 : i32
    %c0_i32_0 = arith.constant 0 : i32
    %c0_i32_1 = arith.constant 0 : i32
    %c0_i32_2 = arith.constant 0 : i32
    return %c0_i32, %c0_i32_0, %c0_i32_1 : i32, i32, i32
  }
  func.func @transform_3(%arg0: i32, %arg1: i32) -> (i32, i32) {
    %c0_i32 = arith.constant 0 : i32
    %c0_i32_0 = arith.constant 0 : i32
    %c0_i32_1 = arith.constant 0 : i32
    return %c0_i32, %c0_i32_0 : i32, i32
  }
  func.func @transform_4(%arg0: i32, %arg1: i32) -> (i32, i32) {
    %c0_i32 = arith.constant 0 : i32
    %c0_i32_0 = arith.constant 0 : i32
    %c0_i32_1 = arith.constant 0 : i32
    return %c0_i32, %c0_i32_0 : i32, i32
  }
  func.func @transform_5(%arg0: i32, %arg1: i32) -> (i32, i32, i32) {
    %c0_i32 = arith.constant 0 : i32
    %c0_i32_0 = arith.constant 0 : i32
    return %arg0, %arg1, %c0_i32 : i32, i32, i32
  }
}

</mosaic_0001>

<bundles_post_ra>
// kernel: up_conv_forward.2
= control target key start
LH: loop header
LB: loop body
LE: loop exit
PB: predicated region body
PF: predicated region fallthrough
CT: control target
= control target key end

     0   :  { %s1027_s12 = smov 0   ;;  %s1029_s13 = smov 0   ;;  %s1243_s0 = inlined_call_operand.vmem [shape: bf16[2,16,64], index: 0, kind: input, shape index: {}]   ;;  %s1244_s1 = inlined_call_operand.vmem [shape: bf16[1,34,16], index: 1, kind: input, shape index: {}]   ;;  %s1245_s2 = inlined_call_operand.vmem [shape: bf16[3,64,256], index: 2, kind: input, shape index: {}]   ;;  %s1246_s3 = inlined_call_operand.vmem [shape: f32[2,1,2,256], index: 3, kind: output, shape index: {}]  }
   0x1   :  { %s1031_s14 = smov 0  }
   0x2 LB: > { %s25_s15 = sadd.s32 1, %s1001_s13  ;;  %p779_p0 = scmp.ge.s32.totalorder %s1005_s14, 1  ;;  %s1005_s14 = sphi %s1031_s14, %s13_s14   ;;  %s1001_s13 = sphi %s1029_s13, %s1250_s13   ;;  %s997_s12 = sphi %s1027_s12, %s1249_s12  }
   0x3   : > { %p27_p1 = scmp.ge.s32.totalorder %s25_s15, 2  ;;  %p161_p2 = scmp.lt.s32.totalorder %s1005_s14, 3 }
   0x5   : > { %s1252_s15 = smov (%p27_p1, %s25_s15), 0  ;;  %p162_p3 = pnand %p779_p0, %p161_p2 }
   0x6   : > { %p194_p4 = scmp.lt.s32.totalorder (!%p162_p3), %s997_s12, 1 }
   0x7   : > { %165 = sbr.rel (%p162_p3) target bundleno = 410 (0x19a), region = 32 }
   0xc   : > { %s1254_s12 = smov (!%p194_p4, %s997_s12), 1  ;;  %v928_v1 = vld [vmem:[%s1244_s1] sm:$0xff]  ;;  %vm240_vm0 = vcmask 130048   ;;  %v929_v2 = vld [vmem:[%s1244_s1 + $0x8] sm:$0xff]  ;;  %v218_v3 = vld [vmem:[%s1244_s1 + $0x10] sm:$0x1] }
   0xd   : > { %s926_s16 = sshll.u32 %s1254_s12, 3  ;;  %v230_v4 = vunpack.c.l.b16 %v218_v3  ;;  %v869_v6 = vld [vmem:[%s1245_s2 + $0x30] sm:$0xf]  ;;  %v938_v7 = vld [vmem:[%s1245_s2 + $0x34] sm:$0xf0]  ;;  %vm369_vm1 = vcmask 523264  }
   0xe   : > { %s198_s19 = scalar_lea.vmem %s1243_s0, %s926_s16  ;;  %v870_v8 = vor.u32 %v938_v7, %v869_v6  ;;  %v861_v9 = vld [vmem:[%s1245_s2 + $0x20] sm:$0xf]  ;;  %v936_v10 = vld [vmem:[%s1245_s2 + $0x24] sm:$0xf0]  ;;  %v853_v12 = vld [vmem:[%s1245_s2 + $0x10] sm:$0xf] }
   0xf   : > { %v930_v0 = vld [vmem:[%s198_s19] sm:$0xff]  ;;  %v233_v5 = vpack.c.b16 %v230_v4, %v230_v4  ;;  %v862_v11 = vor.u32 %v936_v10, %v861_v9  ;;  %v934_v13 = vld [vmem:[%s1245_s2 + $0x14] sm:$0xf0]  ;;  %v932_v16 = vld [vmem:[%s1245_s2 + $0x4] sm:$0xf0]  ;;  %vm505_vm3 = vcmask 1046528  }
  0x10   : > { %257 = vmatpush.bf16.msra.mxu0 %v930_v0  ;;  %462 = vmatpush.bf16.msra.mxu3 %v870_v8  ;;  %v854_v14 = vor.u32 %v934_v13, %v853_v12  ;;  %v845_v15 = vld [vmem:[%s1245_s2] sm:$0xf]  ;;  %v833_v18 = vld [vmem:[%s1245_s2 + $0x70] sm:$0xf]  ;;  %v946_v19 = vld [vmem:[%s1245_s2 + $0x74] sm:$0xf0] }
  0x11   : > { %v846_v17 = vor.u32 %v932_v16, %v845_v15  ;;  %v945_v20 = vld [vmem:[%s1245_s2 + $0x74] sm:$0xf]  ;;  %v834_v21 = vor.u32 %v946_v19, %v833_v18  ;;  %v835_v22 = vld [vmem:[%s1245_s2 + $0x78] sm:$0xf0]  ;;  %v825_v24 = vld [vmem:[%s1245_s2 + $0x60] sm:$0xf] }
  0x12   : > { %v838_v23 = vor.u32 %v945_v20, %v835_v22  ;;  %v944_v25 = vld [vmem:[%s1245_s2 + $0x64] sm:$0xf0]  ;;  %v943_v26 = vld [vmem:[%s1245_s2 + $0x64] sm:$0xf]  ;;  %v827_v28 = vld [vmem:[%s1245_s2 + $0x68] sm:$0xf0] }
  0x13   : > { %796 = vmatmul.msk.bf16.vlgmr.msra.gmra.mxu0 %vm240_vm0, %v928_v1  ;;  %955 = vmatpush.bf16.msra.mxu1 %v834_v21  ;;  %v826_v27 = vor.u32 %v944_v25, %v825_v24  ;;  %v830_v29 = vor.u32 %v943_v26, %v827_v28  ;;  %v817_v30 = vld [vmem:[%s1245_s2 + $0x50] sm:$0xf]  ;;  %v942_v31 = vld [vmem:[%s1245_s2 + $0x54] sm:$0xf0]  ;;  %v941_v32 = vld [vmem:[%s1245_s2 + $0x54] sm:$0xf] }
  0x14   : > { %463 = vmatpush.bf16.msra.mxu3 %v862_v11  ;;  %380 = vmatpush.bf16.msrb.mxu0 %v834_v21  ;;  %v818_v33 = vor.u32 %v942_v31, %v817_v30  ;;  %v819_v34 = vld [vmem:[%s1245_s2 + $0x58] sm:$0xf0]  ;;  %v953_v36 = vld [vmem:[%s1245_s2 + $0xb4] sm:$0xf]  ;;  %v809_v39 = vld [vmem:[%s1245_s2 + $0x40] sm:$0xf] }
  0x15   : > { %399 = vmatpush.bf16.msra.mxu2 %v838_v23  ;;  %v822_v35 = vor.u32 %v941_v32, %v819_v34  ;;  %v915_v37 = vld [vmem:[%s1245_s2 + $0xb8] sm:$0xf0]  ;;  %v940_v40 = vld [vmem:[%s1245_s2 + $0x44] sm:$0xf0]  ;;  %v939_v41 = vld [vmem:[%s1245_s2 + $0x44] sm:$0xf] }
  0x16   : > { %v918_v38 = vor.u32 %v953_v36, %v915_v37  ;;  %v810_v42 = vor.u32 %v940_v40, %v809_v39  ;;  %v811_v43 = vld [vmem:[%s1245_s2 + $0x48] sm:$0xf0]  ;;  %v951_v46 = vld [vmem:[%s1245_s2 + $0xa4] sm:$0xf]  ;;  %v949_v49 = vld [vmem:[%s1245_s2 + $0x94] sm:$0xf] }
  0x17   : > { %956 = vmatpush.bf16.msra.mxu1 %v826_v27  ;;  %v814_v45 = vor.u32 %v939_v41, %v811_v43  ;;  %v907_v47 = vld [vmem:[%s1245_s2 + $0xa8] sm:$0xf0]  ;;  %v899_v50 = vld [vmem:[%s1245_s2 + $0x98] sm:$0xf0]  ;;  %v913_v55 = vld [vmem:[%s1245_s2 + $0xb0] sm:$0xf] }
  0x18   : > { %464 = vmatpush.bf16.msra.mxu3 %v854_v14  ;;  %381 = vmatpush.bf16.msrb.mxu0 %v826_v27  ;;  %v910_v48 = vor.u32 %v951_v46, %v907_v47  ;;  %v902_v51 = vor.u32 %v949_v49, %v899_v50  ;;  %v954_v56 = vld [vmem:[%s1245_s2 + $0xb4] sm:$0xf0]  ;;  %v947_v57 = vld [vmem:[%s1245_s2 + $0x84] sm:$0xf]  ;;  %v891_v59 = vld [vmem:[%s1245_s2 + $0x88] sm:$0xf0] }
  0x19   : > { %400 = vmatpush.bf16.msra.mxu2 %v830_v29  ;;  %v914_v58 = vor.u32 %v954_v56, %v913_v55  ;;  %v937_v60 = vld [vmem:[%s1245_s2 + $0x34] sm:$0xf]  ;;  %v871_v61 = vld [vmem:[%s1245_s2 + $0x38] sm:$0xf0]  ;;  %v894_v0 = vor.u32 %v947_v57, %v891_v59  ;;  %v952_v3 = vld [vmem:[%s1245_s2 + $0xa4] sm:$0xf0] }
  0x1a   : > { %v874_v1 = vor.u32 %v937_v60, %v871_v61  ;;  %v935_v6 = vld [vmem:[%s1245_s2 + $0x24] sm:$0xf]  ;;  %v863_v7 = vld [vmem:[%s1245_s2 + $0x28] sm:$0xf0]  ;;  %v933_v10 = vld [vmem:[%s1245_s2 + $0x14] sm:$0xf] }
  0x1b   : > { %957 = vmatpush.bf16.msra.mxu1 %v818_v33  ;;  %v866_v8 = vor.u32 %v935_v6, %v863_v7  ;;  %v855_v11 = vld [vmem:[%s1245_s2 + $0x18] sm:$0xf0]  ;;  %v897_v13 = vld [vmem:[%s1245_s2 + $0x90] sm:$0xf]  ;;  %v950_v14 = vld [vmem:[%s1245_s2 + $0x94] sm:$0xf0] }
  0x1c   : > { %465 = vmatpush.bf16.msra.mxu3 %v846_v17  ;;  %382 = vmatpush.bf16.msrb.mxu0 %v818_v33  ;;  %v858_v12 = vor.u32 %v933_v10, %v855_v11  ;;  %v931_v15 = vld [vmem:[%s1245_s2 + $0x4] sm:$0xf]  ;;  %v898_v16 = vor.u32 %v950_v14, %v897_v13  ;;  %v847_v17 = vld [vmem:[%s1245_s2 + $0x8] sm:$0xf0]  ;;  %v889_v25 = vld [vmem:[%s1245_s2 + $0x80] sm:$0xf] }
  0x1d   : > { %401 = vmatpush.bf16.msra.mxu2 %v822_v35  ;;  %v850_v18 = vor.u32 %v931_v15, %v847_v17  ;;  %v948_v26 = vld [vmem:[%s1245_s2 + $0x84] sm:$0xf0]  ;;  %vm308_vm2 = vsmask.f32 7424  ;;  %s927_s30 = sshll.u32 %s1254_s12, 2  ;;  %vm634_vm4 = vcmask 1040384  }
  0x1e   : > { %v890_v29 = vor.u32 %v948_v26, %v889_v25  ;;  %s1220_s6 = scalar_lea.vmem %s1246_s3, %s927_s30 }
  0x1f   : > { %958 = vmatpush.bf16.msra.mxu1 %v810_v42 }
  0x20   : > { %580 = vmatpush.bf16.msrb.mxu3 %v918_v38  ;;  %383 = vmatpush.bf16.msrb.mxu0 %v810_v42 }
  0x21   : > { %402 = vmatpush.bf16.msra.mxu2 %v814_v45 }
  0x23   : > { %797 = vmatmul.msk.bf16.gmra.mxu0 %vm240_vm0, %v929_v2  ;;  %v905_v2 = vld [vmem:[%s1245_s2 + $0xa0] sm:$0xf]  ;;  %481 = vmatpush.bf16.msrb.mxu1 %v874_v1 }
  0x24   : > { %581 = vmatpush.bf16.msrb.mxu3 %v910_v48 }
  0x25   : > { %561 = vmatpush.bf16.msrb.mxu2 %v914_v58 }
  0x27   : > { %482 = vmatpush.bf16.msrb.mxu1 %v866_v8 }
  0x28   : > { %582 = vmatpush.bf16.msrb.mxu3 %v902_v51 }
  0x2b   : > { %483 = vmatpush.bf16.msrb.mxu1 %v858_v12 }
  0x2c   : > { %583 = vmatpush.bf16.msrb.mxu3 %v894_v0 }
  0x2f   : > { %484 = vmatpush.bf16.msrb.mxu1 %v850_v18 }
  0x33   : > { %798 = vmatmul.msk.bf16.gmra.mxu0 %vm240_vm0, %v233_v5  ;;  %v906_v5 = vor.u32 %v952_v3, %v905_v2 }
  0x35   : > { %562 = vmatpush.bf16.msrb.mxu2 %v906_v5 }
  0x39   : > { %563 = vmatpush.bf16.msrb.mxu2 %v898_v16 }
  0x3d   : > { %564 = vmatpush.bf16.msrb.mxu2 %v890_v29 }
  0x90   : > { %v259_v44 = vpop.f32.mrf.mxu0 }
  0x91   : > { %v273_v52 = vpack.c.bf16 %v259_v44, %v259_v44 }
  0x93   : > { %v300_v62 = vunpack.c.l.b16 %v273_v52 }
  0x98   : > { %v261_v53 = vpop.f32.mrf.mxu0 }
  0x99   : > { %v274_v54 = vpack.c.bf16 %v261_v53, %v261_v53 }
  0x9b   : > { %v301_v63 = vunpack.c.l.b16 %v274_v54 }
  0x9d   : > { %v305_v4 = vpack.c.b16 %v301_v63, %v300_v62 }
  0x9f   : > { %875 = vmatmul.msk.bf16.vlgmr.msra.gmra.mxu3 %vm369_vm1, %v305_v4  ;;  %v312_v22 = vshll.u32 %v305_v4, 16  ;;  %v310_v30 = vshrl.u32 %v305_v4, 16  ;;  %v506_v46 = vrot.slane %v305_v4, 1 }
  0xa0   : > { %v264_v9 = vpop.f32.mrf.mxu0 }
  0xa1   : > { %v275_v19 = vpack.c.bf16 %v264_v9, %v264_v9  ;;  %v314_v28 = vrot.slane %v312_v22, 1 }
  0xa3   : > { %v302_v23 = vunpack.c.l.b16 %v275_v19  ;;  %v315_v34 = vor.u32 %v314_v28, %v310_v30 }
  0xa8   : > { %v266_v20 = vpop.f32.mrf.mxu0 }
  0xa9   : > { %v276_v21 = vpack.c.bf16 %v266_v20, %v266_v20 }
  0xab   : > { %v303_v24 = vunpack.c.l.b16 %v276_v21 }
  0xad   : > { %v306_v27 = vpack.c.b16 %v303_v24, %v302_v23 }
  0xaf   : > { %876 = vmatmul.msk.bf16.gmra.mxu3 %vm369_vm1, %v306_v27  ;;  %v317_v31 = vshll.u32 %v306_v27, 16  ;;  %v321_v40 = vshrl.u32 %v306_v27, 16  ;;  %v507_v44 = vrot.slane %v306_v27, 1 }
  0xb0   : > { %v269_v32 = vpop.f32.mrf.mxu0 }
  0xb1   : > { %v277_v33 = vpack.c.bf16 %v269_v32, %v269_v32  ;;  %v319_v35 = vrot.slane %v317_v31, 1  ;;  %v508_v47 = vsel %vm505_vm3, %v506_v46, %v507_v44 }
  0xb3   : > { %v304_v36 = vunpack.c.l.b16 %v277_v33  ;;  %v320_v37 = vsel %vm308_vm2, %v315_v34, %v319_v35  ;;  %v323_v43 = vor.u32 %v321_v40, %v319_v35 }
  0xb4   : > { %839 = vmatmul.msk.bf16.vlgmr.msrb.gmra.mxu0 %vm369_vm1, %v320_v37  ;;  %841 = vmatmul.msk.bf16.vlgmr.msra.gmra.mxu2 %vm369_vm1, %v320_v37 }
  0xb5   : > { %v307_v38 = vpack.c.b16 %v304_v36, %v304_v36 }
  0xb7   : > { %v325_v39 = vshll.u32 %v307_v38, 16  ;;  %v509_v48 = vrot.slane %v307_v38, 1 }
  0xb8   : > { %v271_v41 = vpop.f32.mrf.mxu0 }
  0xb9   : > { %v327_v42 = vrot.slane %v325_v39, 1  ;;  %v510_v49 = vsel %vm505_vm3, %v507_v44, %v509_v48 }
  0xbb   : > { %v328_v45 = vsel %vm308_vm2, %v323_v43, %v327_v42 }
  0xbc   : > { %840 = vmatmul.msk.bf16.vlgmr.msra.gmra.mxu1 %vm369_vm1, %v328_v45 }
  0xbf   : > { %921 = vmatmul.msk.bf16.vlgmr.msrb.gmra.mxu3 %vm369_vm1, %v508_v47 }
  0xc4   : > { %842 = vmatmul.msk.bf16.gmra.mxu2 %vm369_vm1, %v328_v45 }
  0xcc   : > { %877 = vmatmul.msk.bf16.vlgmr.msrb.gmra.mxu1 %vm369_vm1, %v305_v4 }
  0xcf   : > { %922 = vmatmul.msk.bf16.gmra.mxu3 %vm369_vm1, %v510_v49 }
  0xd4   : > { %919 = vmatmul.msk.bf16.vlgmr.msrb.gmra.mxu2 %vm369_vm1, %v508_v47 }
  0xdc   : > { %878 = vmatmul.msk.bf16.gmra.mxu1 %vm369_vm1, %v306_v27 }
  0xe4   : > { %920 = vmatmul.msk.bf16.gmra.mxu2 %vm369_vm1, %v510_v49 }
 0x122   : > { %v467_v50 = vpop.f32.mrf.mxu3 }
 0x12a   : > { %v469_v51 = vpop.f32.mrf.mxu3 }
 0x131   : > { %v385_v4 = vpop.f32.mrf.mxu0 }
 0x132   : > { %v472_v52 = vpop.f32.mrf.mxu3  ;;  %v468_v22 = vadd.f32 %v467_v50, %v385_v4 }
 0x137   : > { %v404_v53 = vpop.f32.mrf.mxu2 }
 0x139   : > { %v390_v54 = vpop.f32.mrf.mxu1  ;;  %v387_v17 = vpop.f32.mrf.mxu0 }
 0x13a   : > { %v474_v55 = vpop.f32.mrf.mxu3  ;;  %v470_v20 = vadd.f32 %v469_v51, %v387_v17  ;;  %v473_v23 = vadd.f32 %v472_v52, %v390_v54  ;;  %v637_v51 = vlaneseq }
 0x13c   : > { %vm1222_vm5 = vcmp.lt.s32.totalorder %v637_v51, 256 }
 0x13f   : > { %v406_v56 = vpop.f32.mrf.mxu2 }
 0x141   : > { %v392_v57 = vpop.f32.mrf.mxu1 }
 0x142   : > { %v585_v58 = vpop.f32.mrf.mxu3  ;;  %v475_v29 = vadd.f32 %v474_v55, %v392_v57 }
 0x147   : > { %v409_v59 = vpop.f32.mrf.mxu2 }
 0x149   : > { %v486_v60 = vpop.f32.mrf.mxu1 }
 0x14a   : > { %v587_v61 = vpop.f32.mrf.mxu3  ;;  %v487_v5 = vadd.f32 %v486_v60, %v404_v53 }
 0x14c   : > { %v596_v9 = vadd.f32 %v585_v58, %v487_v5 }
 0x14f   : > { %v411_v62 = vpop.f32.mrf.mxu2 }
 0x151   : > { %v488_v63 = vpop.f32.mrf.mxu1 }
 0x152   : > { %v590_v1 = vpop.f32.mrf.mxu3  ;;  %v489_v3 = vadd.f32 %v488_v63, %v406_v56 }
 0x154   : > { %v598_v7 = vadd.f32 %v587_v61, %v489_v3 }
 0x156   : > { %v612_v12 = vadd.f32 %v598_v7, %v596_v9 }
 0x157   : > { %v566_v0 = vpop.f32.mrf.mxu2 }
 0x158   : > { %v595_v26 = vadd.f32 %v566_v0, %v468_v22 }
 0x159   : > { %v491_v2 = vpop.f32.mrf.mxu1 }
 0x15a   : > { %v492_v6 = vadd.f32 %v491_v2, %v409_v59  ;;  %v592_v14 = vpop.f32.mrf.mxu3 }
 0x15c   : > { %v600_v10 = vadd.f32 %v590_v1, %v492_v6 }
 0x15e   : > { %v613_v15 = vadd.f32 %v612_v12, %v600_v10 }
 0x15f   : > { %v568_v8 = vpop.f32.mrf.mxu2 }
 0x160   : > { %v597_v24 = vadd.f32 %v568_v8, %v470_v20 }
 0x161   : > { %v493_v11 = vpop.f32.mrf.mxu1 }
 0x162   : > { %v494_v13 = vadd.f32 %v493_v11, %v411_v62  ;;  %v603_v30 = vadd.f32 %v597_v24, %v595_v26 }
 0x164   : > { %v602_v16 = vadd.f32 %v592_v14, %v494_v13 }
 0x166   : > { %v614_v18 = vadd.f32 %v613_v15, %v602_v16 }
 0x167   : > { %v571_v19 = vpop.f32.mrf.mxu2 }
 0x168   : > { %v615_v21 = vrot.slane %v614_v18, 4  ;;  %v599_v28 = vadd.f32 %v571_v19, %v473_v23 }
 0x16a   : > { %v616_v25 = vadd.f32 %v615_v21, %v614_v18  ;;  %v604_v34 = vadd.f32 %v603_v30, %v599_v28 }
 0x16c   : > { %v617_v27 = vrot.slane %v616_v25, 2 }
 0x16e   : > { %v618_v31 = vadd.f32 %v617_v27, %v616_v25 }
 0x16f   : > { %v573_v32 = vpop.f32.mrf.mxu2 }
 0x170   : > { %v619_v33 = vrot.slane %v618_v31, 1  ;;  %v601_v35 = vadd.f32 %v573_v32, %v475_v29 }
 0x172   : > { %v620_v36 = vadd.f32 %v619_v33, %v618_v31  ;;  %v605_v37 = vadd.f32 %v604_v34, %v601_v35 }
 0x174   : > { %v622_v38 = vmul.f32 0.03125, %v620_v36  ;;  %v606_v39 = vrot.slane %v605_v37, 4  ;;  %v633_v56 = vrot.slane %v620_v36, 7 }
 0x176   : > { %v624_v40 = vsub.f32 %v596_v9, %v622_v38  ;;  %v626_v41 = vsub.f32 %v598_v7, %v622_v38  ;;  %v628_v42 = vsub.f32 %v600_v10, %v622_v38  ;;  %v607_v43 = vadd.f32 %v606_v39, %v605_v37 }
 0x177   : > { %v630_v44 = vsub.f32 %v602_v16, %v622_v38 }
 0x178   : > { %v643_v45 = vmul.f32 %v624_v40, %v624_v40  ;;  %v645_v46 = vmul.f32 %v626_v41, %v626_v41  ;;  %v608_v47 = vrot.slane %v607_v43, 2  ;;  %v647_v48 = vmul.f32 %v628_v42, %v628_v42 }
 0x179   : > { %v649_v52 = vmul.f32 %v630_v44, %v630_v44 }
 0x17a   : > { %v659_v49 = vadd.f32 %v645_v46, %v643_v45  ;;  %v609_v50 = vadd.f32 %v608_v47, %v607_v43 }
 0x17c   : > { %v660_v53 = vadd.f32 %v659_v49, %v647_v48  ;;  %v610_v54 = vrot.slane %v609_v50, 1 }
 0x17e   : > { %v661_v55 = vadd.f32 %v660_v53, %v649_v52  ;;  %v611_v57 = vadd.f32 %v610_v54, %v609_v50 }
 0x180   : > { %v662_v59 = vrot.slane %v661_v55, 4  ;;  %v621_v60 = vmul.f32 0.03125, %v611_v57  ;;  %v635_v61 = vsel %vm634_vm4, %v611_v57, %v633_v56 }
 0x181   : > { %641 = vst.msk [vmem:[%s1220_s6] ss:$2 sm:$0x3] %vm1222_vm5, %v635_v61 }
 0x182   : > { %v663_v62 = vadd.f32 %v662_v59, %v661_v55  ;;  %v623_v63 = vsub.f32 %v595_v26, %v621_v60  ;;  %v625_v0 = vsub.f32 %v597_v24, %v621_v60  ;;  %v627_v1 = vsub.f32 %v599_v28, %v621_v60 }
 0x183   : > { %v629_v2 = vsub.f32 %v601_v35, %v621_v60 }
 0x184   : > { %v642_v3 = vmul.f32 %v623_v63, %v623_v63  ;;  %v644_v4 = vmul.f32 %v625_v0, %v625_v0  ;;  %v664_v5 = vrot.slane %v663_v62, 2  ;;  %v646_v6 = vmul.f32 %v627_v1, %v627_v1 }
 0x185   : > { %v648_v8 = vmul.f32 %v629_v2, %v629_v2 }
 0x186   : > { %v650_v7 = vadd.f32 %v644_v4, %v642_v3  ;;  %v665_v10 = vadd.f32 %v664_v5, %v663_v62 }
 0x188   : > { %v651_v9 = vadd.f32 %v650_v7, %v646_v6  ;;  %v666_v13 = vrot.slane %v665_v10, 1 }
 0x18a   : > { %v652_v11 = vadd.f32 %v651_v9, %v648_v8  ;;  %v667_v16 = vadd.f32 %v666_v13, %v665_v10 }
 0x18c   : > { %v653_v12 = vrot.slane %v652_v11, 4  ;;  %v670_v19 = vrot.slane %v667_v16, 7 }
 0x18e   : > { %v654_v14 = vadd.f32 %v653_v12, %v652_v11 }
 0x190   : > { %v655_v15 = vrot.slane %v654_v14, 2 }
 0x192   : > { %v656_v17 = vadd.f32 %v655_v15, %v654_v14 }
 0x194   : > { %v657_v18 = vrot.slane %v656_v17, 1 }
 0x196   : > { %v658_v20 = vadd.f32 %v657_v18, %v656_v17 }
 0x198   : > { %v671_v21 = vsel %vm634_vm4, %v658_v20, %v670_v19 }
 0x199   : > { %923 = vst.msk [vmem:[%s1220_s6 + $0x1] ss:$2 sm:$0x3] %vm1222_vm5, %v671_v21 }
 0x19a PF: > { %s13_s14 = sadd.s32 1, %s1005_s14   ;;  %s1249_s12 = smov %s1001_s13 }
 0x19b   : > { %p10_p5 = scmp.ge.s32.totalorder %s13_s14, 4   ;;  %s1250_s13 = smov %s1252_s15 }
 0x19d   :  { %12 = sbr.rel (!%p10_p5) target bundleno = 2 (0x2), region = 68 }

// kernel: up_conv_forward.3
= control target key start
LH: loop header
LB: loop body
LE: loop exit
PB: predicated region body
PF: predicated region fallthrough
CT: control target
= control target key end

     0   :  { %s1068_s18 = smov 0   ;;  %s1070_s19 = smov 0   ;;  %s1292_s0 = inlined_call_operand.vmem [shape: bf16[2,16,64], index: 0, kind: input, shape index: {}]   ;;  %s1293_s1 = inlined_call_operand.vmem [shape: bf16[1,34,16], index: 1, kind: input, shape index: {}]   ;;  %s1294_s2 = inlined_call_operand.vmem [shape: bf16[3,64,256], index: 2, kind: input, shape index: {}]   ;;  %s1295_s3 = inlined_call_operand.vmem [shape: f32[1,256], index: 3, kind: input, shape index: {}]   ;;  %s1296_s4 = inlined_call_operand.vmem [shape: f32[1,256], index: 4, kind: input, shape index: {}]   ;;  %s1297_s5 = inlined_call_operand.vmem [shape: f32[2,32,256], index: 5, kind: output, shape index: {}]  }
   0x1   :  { %s1072_s20 = smov 0  }
   0x2 LB: > { %s27_s21 = sadd.s32 1, %s1032_s19  ;;  %p811_p0 = scmp.ge.s32.totalorder %s1036_s20, 1  ;;  %s1036_s20 = sphi %s1072_s20, %s15_s20   ;;  %s1032_s19 = sphi %s1070_s19, %s1299_s19   ;;  %s1028_s18 = sphi %s1068_s18, %s1298_s18  }
   0x3   : > { %p29_p1 = scmp.ge.s32.totalorder %s27_s21, 2  ;;  %p211_p2 = scmp.lt.s32.totalorder %s1036_s20, 3 }
   0x5   : > { %s1301_s21 = smov (%p29_p1, %s27_s21), 0  ;;  %p212_p3 = pnand %p811_p0, %p211_p2 }
   0x6   : > { %p249_p4 = scmp.lt.s32.totalorder (!%p212_p3), %s1028_s18, 1 }
   0x7   : > { %215 = sbr.rel (%p212_p3) target bundleno = 377 (0x179), region = 40 }
   0xc   : > { %s1303_s18 = smov (!%p249_p4, %s1028_s18), 1  ;;  %v959_v1 = vld [vmem:[%s1293_s1] sm:$0xff]  ;;  %vm297_vm0 = vcmask 130048   ;;  %v960_v2 = vld [vmem:[%s1293_s1 + $0x8] sm:$0xff]  ;;  %v275_v3 = vld [vmem:[%s1293_s1 + $0x10] sm:$0x1] }
   0xd   : > { %s957_s22 = sshll.u32 %s1303_s18, 3  ;;  %v287_v4 = vunpack.c.l.b16 %v275_v3  ;;  %v901_v6 = vld [vmem:[%s1294_s2 + $0x30] sm:$0xf]  ;;  %v969_v7 = vld [vmem:[%s1294_s2 + $0x34] sm:$0xf0]  ;;  %vm426_vm1 = vcmask 523264  }
   0xe   : > { %s253_s25 = scalar_lea.vmem %s1292_s0, %s957_s22  ;;  %v902_v8 = vor.u32 %v969_v7, %v901_v6  ;;  %v893_v9 = vld [vmem:[%s1294_s2 + $0x20] sm:$0xf]  ;;  %v967_v10 = vld [vmem:[%s1294_s2 + $0x24] sm:$0xf0]  ;;  %v885_v12 = vld [vmem:[%s1294_s2 + $0x10] sm:$0xf] }
   0xf   : > { %v961_v0 = vld [vmem:[%s253_s25] sm:$0xff]  ;;  %v290_v5 = vpack.c.b16 %v287_v4, %v287_v4  ;;  %v894_v11 = vor.u32 %v967_v10, %v893_v9  ;;  %v965_v13 = vld [vmem:[%s1294_s2 + $0x14] sm:$0xf0]  ;;  %v963_v16 = vld [vmem:[%s1294_s2 + $0x4] sm:$0xf0]  ;;  %vm562_vm3 = vcmask 1046528  }
  0x10   : > { %314 = vmatpush.bf16.msra.mxu0 %v961_v0  ;;  %519 = vmatpush.bf16.msra.mxu3 %v902_v8  ;;  %v886_v14 = vor.u32 %v965_v13, %v885_v12  ;;  %v877_v15 = vld [vmem:[%s1294_s2] sm:$0xf]  ;;  %v865_v18 = vld [vmem:[%s1294_s2 + $0x70] sm:$0xf]  ;;  %v977_v19 = vld [vmem:[%s1294_s2 + $0x74] sm:$0xf0] }
  0x11   : > { %v878_v17 = vor.u32 %v963_v16, %v877_v15  ;;  %v976_v20 = vld [vmem:[%s1294_s2 + $0x74] sm:$0xf]  ;;  %v866_v21 = vor.u32 %v977_v19, %v865_v18  ;;  %v867_v22 = vld [vmem:[%s1294_s2 + $0x78] sm:$0xf0]  ;;  %v857_v24 = vld [vmem:[%s1294_s2 + $0x60] sm:$0xf] }
  0x12   : > { %v870_v23 = vor.u32 %v976_v20, %v867_v22  ;;  %v975_v25 = vld [vmem:[%s1294_s2 + $0x64] sm:$0xf0]  ;;  %v974_v26 = vld [vmem:[%s1294_s2 + $0x64] sm:$0xf]  ;;  %v859_v28 = vld [vmem:[%s1294_s2 + $0x68] sm:$0xf0] }
  0x13   : > { %828 = vmatmul.msk.bf16.vlgmr.msra.gmra.mxu0 %vm297_vm0, %v959_v1  ;;  %986 = vmatpush.bf16.msra.mxu1 %v866_v21  ;;  %v858_v27 = vor.u32 %v975_v25, %v857_v24  ;;  %v862_v29 = vor.u32 %v974_v26, %v859_v28  ;;  %v849_v30 = vld [vmem:[%s1294_s2 + $0x50] sm:$0xf]  ;;  %v973_v31 = vld [vmem:[%s1294_s2 + $0x54] sm:$0xf0]  ;;  %v972_v32 = vld [vmem:[%s1294_s2 + $0x54] sm:$0xf] }
  0x14   : > { %520 = vmatpush.bf16.msra.mxu3 %v894_v11  ;;  %437 = vmatpush.bf16.msrb.mxu0 %v866_v21  ;;  %v850_v33 = vor.u32 %v973_v31, %v849_v30  ;;  %v851_v34 = vld [vmem:[%s1294_s2 + $0x58] sm:$0xf0]  ;;  %v984_v36 = vld [vmem:[%s1294_s2 + $0xb4] sm:$0xf]  ;;  %v841_v39 = vld [vmem:[%s1294_s2 + $0x40] sm:$0xf] }
  0x15   : > { %456 = vmatpush.bf16.msra.mxu2 %v870_v23  ;;  %v854_v35 = vor.u32 %v972_v32, %v851_v34  ;;  %v947_v37 = vld [vmem:[%s1294_s2 + $0xb8] sm:$0xf0]  ;;  %v971_v40 = vld [vmem:[%s1294_s2 + $0x44] sm:$0xf0]  ;;  %v970_v41 = vld [vmem:[%s1294_s2 + $0x44] sm:$0xf] }
  0x16   : > { %v950_v38 = vor.u32 %v984_v36, %v947_v37  ;;  %v842_v42 = vor.u32 %v971_v40, %v841_v39  ;;  %v843_v43 = vld [vmem:[%s1294_s2 + $0x48] sm:$0xf0]  ;;  %v982_v46 = vld [vmem:[%s1294_s2 + $0xa4] sm:$0xf]  ;;  %v980_v49 = vld [vmem:[%s1294_s2 + $0x94] sm:$0xf] }
  0x17   : > { %987 = vmatpush.bf16.msra.mxu1 %v858_v27  ;;  %v846_v45 = vor.u32 %v970_v41, %v843_v43  ;;  %v939_v47 = vld [vmem:[%s1294_s2 + $0xa8] sm:$0xf0]  ;;  %v931_v50 = vld [vmem:[%s1294_s2 + $0x98] sm:$0xf0]  ;;  %v945_v55 = vld [vmem:[%s1294_s2 + $0xb0] sm:$0xf] }
  0x18   : > { %521 = vmatpush.bf16.msra.mxu3 %v886_v14  ;;  %438 = vmatpush.bf16.msrb.mxu0 %v858_v27  ;;  %v942_v48 = vor.u32 %v982_v46, %v939_v47  ;;  %v934_v51 = vor.u32 %v980_v49, %v931_v50  ;;  %v985_v56 = vld [vmem:[%s1294_s2 + $0xb4] sm:$0xf0]  ;;  %v978_v57 = vld [vmem:[%s1294_s2 + $0x84] sm:$0xf]  ;;  %v923_v59 = vld [vmem:[%s1294_s2 + $0x88] sm:$0xf0] }
  0x19   : > { %457 = vmatpush.bf16.msra.mxu2 %v862_v29  ;;  %v946_v58 = vor.u32 %v985_v56, %v945_v55  ;;  %v968_v60 = vld [vmem:[%s1294_s2 + $0x34] sm:$0xf]  ;;  %v903_v61 = vld [vmem:[%s1294_s2 + $0x38] sm:$0xf0]  ;;  %v926_v0 = vor.u32 %v978_v57, %v923_v59  ;;  %v983_v3 = vld [vmem:[%s1294_s2 + $0xa4] sm:$0xf0] }
  0x1a   : > { %v906_v1 = vor.u32 %v968_v60, %v903_v61  ;;  %v966_v6 = vld [vmem:[%s1294_s2 + $0x24] sm:$0xf]  ;;  %v895_v7 = vld [vmem:[%s1294_s2 + $0x28] sm:$0xf0]  ;;  %v964_v10 = vld [vmem:[%s1294_s2 + $0x14] sm:$0xf] }
  0x1b   : > { %988 = vmatpush.bf16.msra.mxu1 %v850_v33  ;;  %v898_v8 = vor.u32 %v966_v6, %v895_v7  ;;  %v887_v11 = vld [vmem:[%s1294_s2 + $0x18] sm:$0xf0]  ;;  %v929_v13 = vld [vmem:[%s1294_s2 + $0x90] sm:$0xf]  ;;  %v981_v14 = vld [vmem:[%s1294_s2 + $0x94] sm:$0xf0] }
  0x1c   : > { %522 = vmatpush.bf16.msra.mxu3 %v878_v17  ;;  %439 = vmatpush.bf16.msrb.mxu0 %v850_v33  ;;  %v890_v12 = vor.u32 %v964_v10, %v887_v11  ;;  %v962_v15 = vld [vmem:[%s1294_s2 + $0x4] sm:$0xf]  ;;  %v930_v16 = vor.u32 %v981_v14, %v929_v13  ;;  %v879_v17 = vld [vmem:[%s1294_s2 + $0x8] sm:$0xf0]  ;;  %v921_v25 = vld [vmem:[%s1294_s2 + $0x80] sm:$0xf] }
  0x1d   : > { %458 = vmatpush.bf16.msra.mxu2 %v854_v35  ;;  %v882_v18 = vor.u32 %v962_v15, %v879_v17  ;;  %v979_v26 = vld [vmem:[%s1294_s2 + $0x84] sm:$0xf0]  ;;  %vm365_vm2 = vsmask.f32 7424  ;;  %v660_v60 = vld [vmem:[%s1295_s3] sm:$0x3] }
  0x1e   : > { %v922_v29 = vor.u32 %v979_v26, %v921_v25  ;;  %s958_s27 = sshll.u32 %s1303_s18, 6  ;;  %v662_v14 = vperm.slane %v660_v60, 0 }
  0x1f   : > { %989 = vmatpush.bf16.msra.mxu1 %v842_v42  ;;  %s1271_s30 = scalar_lea.vmem %s1297_s5, %s958_s27 }
  0x20   : > { %637 = vmatpush.bf16.msrb.mxu3 %v950_v38  ;;  %440 = vmatpush.bf16.msrb.mxu0 %v842_v42 }
  0x21   : > { %459 = vmatpush.bf16.msra.mxu2 %v846_v45 }
  0x23   : > { %829 = vmatmul.msk.bf16.gmra.mxu0 %vm297_vm0, %v960_v2  ;;  %v937_v2 = vld [vmem:[%s1294_s2 + $0xa0] sm:$0xf]  ;;  %538 = vmatpush.bf16.msrb.mxu1 %v906_v1 }
  0x24   : > { %638 = vmatpush.bf16.msrb.mxu3 %v942_v48 }
  0x25   : > { %618 = vmatpush.bf16.msrb.mxu2 %v946_v58 }
  0x27   : > { %539 = vmatpush.bf16.msrb.mxu1 %v898_v8 }
  0x28   : > { %639 = vmatpush.bf16.msrb.mxu3 %v934_v51 }
  0x2b   : > { %540 = vmatpush.bf16.msrb.mxu1 %v890_v12 }
  0x2c   : > { %640 = vmatpush.bf16.msrb.mxu3 %v926_v0  ;;  %v663_v0 = vperm.slane %v660_v60, 1 }
  0x2f   : > { %541 = vmatpush.bf16.msrb.mxu1 %v882_v18 }
  0x33   : > { %830 = vmatmul.msk.bf16.gmra.mxu0 %vm297_vm0, %v290_v5  ;;  %v938_v5 = vor.u32 %v983_v3, %v937_v2 }
  0x35   : > { %619 = vmatpush.bf16.msrb.mxu2 %v938_v5 }
  0x39   : > { %620 = vmatpush.bf16.msrb.mxu2 %v930_v16 }
  0x3d   : > { %621 = vmatpush.bf16.msrb.mxu2 %v922_v29 }
  0x90   : > { %v316_v44 = vpop.f32.mrf.mxu0 }
  0x91   : > { %v330_v52 = vpack.c.bf16 %v316_v44, %v316_v44 }
  0x93   : > { %v357_v62 = vunpack.c.l.b16 %v330_v52 }
  0x98   : > { %v318_v53 = vpop.f32.mrf.mxu0 }
  0x99   : > { %v331_v54 = vpack.c.bf16 %v318_v53, %v318_v53 }
  0x9b   : > { %v358_v63 = vunpack.c.l.b16 %v331_v54 }
  0x9d   : > { %v362_v4 = vpack.c.b16 %v358_v63, %v357_v62  ;;  %v674_v62 = vld [vmem:[%s1296_s4] sm:$0x3] }
  0x9e   : > { %v677_v2 = vperm.slane %v674_v62, 1  ;;  %v676_v18 = vperm.slane %v674_v62, 0 }
  0x9f   : > { %907 = vmatmul.msk.bf16.vlgmr.msra.gmra.mxu3 %vm426_vm1, %v362_v4  ;;  %v369_v22 = vshll.u32 %v362_v4, 16  ;;  %v367_v30 = vshrl.u32 %v362_v4, 16  ;;  %v563_v46 = vrot.slane %v362_v4, 1 }
  0xa0   : > { %v321_v9 = vpop.f32.mrf.mxu0 }
  0xa1   : > { %v332_v19 = vpack.c.bf16 %v321_v9, %v321_v9  ;;  %v371_v28 = vrot.slane %v369_v22, 1 }
  0xa3   : > { %v359_v23 = vunpack.c.l.b16 %v332_v19  ;;  %v372_v34 = vor.u32 %v371_v28, %v367_v30 }
  0xa8   : > { %v323_v20 = vpop.f32.mrf.mxu0 }
  0xa9   : > { %v333_v21 = vpack.c.bf16 %v323_v20, %v323_v20 }
  0xab   : > { %v360_v24 = vunpack.c.l.b16 %v333_v21 }
  0xad   : > { %v363_v27 = vpack.c.b16 %v360_v24, %v359_v23 }
  0xaf   : > { %908 = vmatmul.msk.bf16.gmra.mxu3 %vm426_vm1, %v363_v27  ;;  %v374_v31 = vshll.u32 %v363_v27, 16  ;;  %v378_v40 = vshrl.u32 %v363_v27, 16  ;;  %v564_v44 = vrot.slane %v363_v27, 1 }
  0xb0   : > { %v326_v32 = vpop.f32.mrf.mxu0 }
  0xb1   : > { %v334_v33 = vpack.c.bf16 %v326_v32, %v326_v32  ;;  %v376_v35 = vrot.slane %v374_v31, 1  ;;  %v565_v47 = vsel %vm562_vm3, %v563_v46, %v564_v44 }
  0xb3   : > { %v361_v36 = vunpack.c.l.b16 %v334_v33  ;;  %v377_v37 = vsel %vm365_vm2, %v372_v34, %v376_v35  ;;  %v380_v43 = vor.u32 %v378_v40, %v376_v35 }
  0xb4   : > { %871 = vmatmul.msk.bf16.vlgmr.msrb.gmra.mxu0 %vm426_vm1, %v377_v37  ;;  %873 = vmatmul.msk.bf16.vlgmr.msra.gmra.mxu2 %vm426_vm1, %v377_v37 }
  0xb5   : > { %v364_v38 = vpack.c.b16 %v361_v36, %v361_v36 }
  0xb7   : > { %v382_v39 = vshll.u32 %v364_v38, 16  ;;  %v566_v48 = vrot.slane %v364_v38, 1 }
  0xb8   : > { %v328_v41 = vpop.f32.mrf.mxu0 }
  0xb9   : > { %v384_v42 = vrot.slane %v382_v39, 1  ;;  %v567_v49 = vsel %vm562_vm3, %v564_v44, %v566_v48 }
  0xbb   : > { %v385_v45 = vsel %vm365_vm2, %v380_v43, %v384_v42 }
  0xbc   : > { %872 = vmatmul.msk.bf16.vlgmr.msra.gmra.mxu1 %vm426_vm1, %v385_v45 }
  0xbf   : > { %953 = vmatmul.msk.bf16.vlgmr.msrb.gmra.mxu3 %vm426_vm1, %v565_v47 }
  0xc4   : > { %874 = vmatmul.msk.bf16.gmra.mxu2 %vm426_vm1, %v385_v45 }
  0xcc   : > { %909 = vmatmul.msk.bf16.vlgmr.msrb.gmra.mxu1 %vm426_vm1, %v362_v4 }
  0xcf   : > { %954 = vmatmul.msk.bf16.gmra.mxu3 %vm426_vm1, %v567_v49 }
  0xd4   : > { %951 = vmatmul.msk.bf16.vlgmr.msrb.gmra.mxu2 %vm426_vm1, %v565_v47 }
  0xdc   : > { %910 = vmatmul.msk.bf16.gmra.mxu1 %vm426_vm1, %v363_v27 }
  0xe4   : > { %952 = vmatmul.msk.bf16.gmra.mxu2 %vm426_vm1, %v567_v49 }
 0x122   : > { %v524_v50 = vpop.f32.mrf.mxu3 }
 0x12a   : > { %v526_v51 = vpop.f32.mrf.mxu3 }
 0x131   : > { %v442_v7 = vpop.f32.mrf.mxu0 }
 0x132   : > { %v529_v52 = vpop.f32.mrf.mxu3  ;;  %v525_v12 = vadd.f32 %v524_v50, %v442_v7 }
 0x137   : > { %v461_v53 = vpop.f32.mrf.mxu2 }
 0x139   : > { %v447_v54 = vpop.f32.mrf.mxu1  ;;  %v444_v24 = vpop.f32.mrf.mxu0 }
 0x13a   : > { %v1257_v55 = vpop.f32.mrf.mxu3  ;;  %v527_v27 = vadd.f32 %v526_v51, %v444_v24  ;;  %v530_v40 = vadd.f32 %v529_v52, %v447_v54 }
 0x13f   : > { %v463_v56 = vpop.f32.mrf.mxu2 }
 0x141   : > { %v1259_v57 = vpop.f32.mrf.mxu1 }
 0x142   : > { %v642_v58 = vpop.f32.mrf.mxu3  ;;  %v532_v49 = vadd.f32 %v1257_v55, %v1259_v57 }
 0x147   : > { %v466_v59 = vpop.f32.mrf.mxu2 }
 0x149   : > { %v543_v61 = vpop.f32.mrf.mxu1 }
 0x14a   : > { %v544_v63 = vadd.f32 %v543_v61, %v461_v53  ;;  %v644_v4 = vpop.f32.mrf.mxu3 }
 0x14c   : > { %v653_v1 = vadd.f32 %v642_v58, %v544_v63 }
 0x14e   : > { %v667_v3 = vmul.f32 %v663_v0, %v653_v1 }
 0x14f   : > { %v468_v5 = vpop.f32.mrf.mxu2 }
 0x150   : > { %v681_v6 = vadd.f32 %v677_v2, %v667_v3 }
 0x151   : > { %v545_v8 = vpop.f32.mrf.mxu1 }
 0x152   : > { %v689_v9 = vmax.f32 %v681_v6, 0.0  ;;  %v546_v10 = vadd.f32 %v545_v8, %v463_v56  ;;  %v647_v19 = vpop.f32.mrf.mxu3 }
 0x154   : > { %697 = vst [vmem:[%s1271_s30 + $0x8] sm:$0xff] %v689_v9  ;;  %v655_v11 = vadd.f32 %v644_v4, %v546_v10 }
 0x156   : > { %v669_v13 = vmul.f32 %v663_v0, %v655_v11 }
 0x157   : > { %v623_v15 = vpop.f32.mrf.mxu2 }
 0x158   : > { %v683_v16 = vadd.f32 %v677_v2, %v669_v13  ;;  %v652_v17 = vadd.f32 %v623_v15, %v525_v12 }
 0x159   : > { %v548_v20 = vpop.f32.mrf.mxu1 }
 0x15a   : > { %v691_v21 = vmax.f32 %v683_v16, 0.0  ;;  %v666_v22 = vmul.f32 %v662_v14, %v652_v17  ;;  %v549_v23 = vadd.f32 %v548_v20, %v466_v59  ;;  %v649_v37 = vpop.f32.mrf.mxu3 }
 0x15c   : > { %699 = vst [vmem:[%s1271_s30 + $0x18] sm:$0xff] %v691_v21  ;;  %v680_v25 = vadd.f32 %v676_v18, %v666_v22  ;;  %v657_v26 = vadd.f32 %v647_v19, %v549_v23 }
 0x15e   : > { %v688_v28 = vmax.f32 %v680_v25, 0.0  ;;  %v671_v29 = vmul.f32 %v663_v0, %v657_v26 }
 0x15f   : > { %v625_v30 = vpop.f32.mrf.mxu2 }
 0x160   : > { %696 = vst [vmem:[%s1271_s30] sm:$0xff] %v688_v28  ;;  %v685_v31 = vadd.f32 %v677_v2, %v671_v29  ;;  %v654_v32 = vadd.f32 %v625_v30, %v527_v27 }
 0x161   : > { %v550_v33 = vpop.f32.mrf.mxu1 }
 0x162   : > { %v693_v34 = vmax.f32 %v685_v31, 0.0  ;;  %v668_v35 = vmul.f32 %v662_v14, %v654_v32  ;;  %v551_v36 = vadd.f32 %v550_v33, %v468_v5 }
 0x164   : > { %701 = vst [vmem:[%s1271_s30 + $0x28] sm:$0xff] %v693_v34  ;;  %v682_v38 = vadd.f32 %v676_v18, %v668_v35  ;;  %v659_v39 = vadd.f32 %v649_v37, %v551_v36 }
 0x166   : > { %v690_v41 = vmax.f32 %v682_v38, 0.0  ;;  %v673_v42 = vmul.f32 %v663_v0, %v659_v39 }
 0x167   : > { %v628_v43 = vpop.f32.mrf.mxu2 }
 0x168   : > { %698 = vst [vmem:[%s1271_s30 + $0x10] sm:$0xff] %v690_v41  ;;  %v687_v44 = vadd.f32 %v677_v2, %v673_v42  ;;  %v656_v45 = vadd.f32 %v628_v43, %v530_v40 }
 0x16a   : > { %v695_v46 = vmax.f32 %v687_v44, 0.0  ;;  %v670_v47 = vmul.f32 %v662_v14, %v656_v45 }
 0x16c   : > { %703 = vst [vmem:[%s1271_s30 + $0x38] sm:$0xff] %v695_v46  ;;  %v684_v48 = vadd.f32 %v676_v18, %v670_v47 }
 0x16e   : > { %v692_v50 = vmax.f32 %v684_v48, 0.0 }
 0x16f   : > { %v630_v51 = vpop.f32.mrf.mxu2 }
 0x170   : > { %700 = vst [vmem:[%s1271_s30 + $0x20] sm:$0xff] %v692_v50  ;;  %v658_v53 = vadd.f32 %v630_v51, %v532_v49 }
 0x172   : > { %v672_v56 = vmul.f32 %v662_v14, %v658_v53 }
 0x174   : > { %v686_v52 = vadd.f32 %v676_v18, %v672_v56 }
 0x176   : > { %v694_v54 = vmax.f32 %v686_v52, 0.0 }
 0x178   : > { %702 = vst [vmem:[%s1271_s30 + $0x30] sm:$0xff] %v694_v54 }
 0x179 PF: > { %s15_s20 = sadd.s32 1, %s1036_s20   ;;  %s1298_s18 = smov %s1032_s19 }
 0x17a   : > { %p12_p5 = scmp.ge.s32.totalorder %s15_s20, 4   ;;  %s1299_s19 = smov %s1301_s21 }
 0x17c   :  { %14 = sbr.rel (!%p12_p5) target bundleno = 2 (0x2), region = 75 }

</bundles_post_ra>
